<compile_context>
chip_gen: v7x
topology: tpu7x:2x2x1
jax: 0.10.0
libtpu: 0.0.40
codegen_flags: <defaults>
</compile_context>

<pallas_src>
import math

import jax
import jax.numpy as jnp
from jax import lax
from jax.experimental import pallas as pl
from jax.experimental.pallas import tpu as pltpu

_MIB = 1024 * 1024


def _round_up(x, m):
    return ((x + m - 1) // m) * m


def _disc_kernel(ws_ref, f_ref, o_ref):
    # ws_ref: (1, H)        -- precomputed weight @ summary (grid-invariant)
    # f_ref : (tile_n, H)   -- streamed features tile
    # o_ref : (1, tile_n)   -- lane-dense output row
    out = lax.dot_general(
        ws_ref[...],
        f_ref[...],
        dimension_numbers=(((1,), (1,)), ((), ())),  # contract on H (ws @ f^T)
        preferred_element_type=jnp.float32,
    )
    o_ref[...] = out.astype(o_ref.dtype)


def _gen_params():
    """(features-bytes-per-tile target, scoped VMEM limit) per TPU generation."""
    kind = ""
    try:
        kind = jax.devices()[0].device_kind.lower()
    except Exception:
        pass
    if "v7" in kind:
        # 64 MiB physical VMEM, ~3.2 TB/s HBM: per-step overhead is
        # proportionally largest, so use the biggest tiles that still fit.
        return 16 * _MIB, 48 * _MIB
    if "v6" in kind:
        return 12 * _MIB, 64 * _MIB
    if "v5" in kind:
        # v5e default scoped VMEM is only 16 MiB -> raise it explicitly.
        return 8 * _MIB, 48 * _MIB
    # Unknown device: conservative defaults.
    return 8 * _MIB, 40 * _MIB


def _pick_tile_n(n, h, itemsize, tile_bytes_target):
    """Row-tile sized by BYTES (~tile_bytes_target of features per step),
    128-aligned for lane-dense output stores, capped to the problem size and
    to >= 2 balanced tiles when there is enough work (v7x megacore)."""
    h_pad = _round_up(h, 128)                      # lane-padded row footprint
    rows = max(128, tile_bytes_target // (h_pad * itemsize))
    tile_n = max(128, (rows // 128) * 128)
    n_rounded = _round_up(max(n, 1), 128)
    tile_n = min(tile_n, n_rounded)
    if tile_n >= 256:
        # Keep at least 2 (balanced) tiles so both v7x TensorCores stream.
        tile_n = min(tile_n, _round_up(-(-n // 2), 128))
    return tile_n


def discriminator_forward(features, weight, summary, *, tile_n=None):
    """features: (N, H), weight: (H, H), summary: (H,) -> (N,)

    Matches Discriminator.forward: features @ (weight @ summary).
    """
    n, h = features.shape
    assert weight.shape == (h, h)
    assert summary.shape == (h,)

    out_dtype = features.dtype
    itemsize = jnp.dtype(features.dtype).itemsize
    tile_bytes_target, vmem_limit = _gen_params()

    # Hoisted, grid-invariant matvec: done once, outside the Pallas kernel.
    ws = jnp.dot(weight, summary, preferred_element_type=jnp.float32)
    ws = ws.astype(features.dtype).reshape(1, h)

    if tile_n is None:
        tile_n = _pick_tile_n(n, h, itemsize, tile_bytes_target)
    tile_n = max(128, _round_up(tile_n, 128))

    num_tiles = pl.cdiv(n, tile_n)
    n_out = num_tiles * tile_n

    # Make sure the scoped VMEM limit covers the double-buffered features
    # stream plus headroom for ws / output buffers and compiler scratch.
    h_pad = _round_up(h, 128)
    vmem_limit = int(max(vmem_limit, 2 * tile_n * h_pad * itemsize + 4 * _MIB))

    cost = pl.CostEstimate(
        flops=2 * n * h,
        transcendentals=0,
        bytes_accessed=n * h * itemsize
        + h * itemsize
        + n_out * jnp.dtype(out_dtype).itemsize,
    )

    # No jnp.pad of features: the partial last block is handled by Pallas.
    # Garbage rows only affect output lanes >= n, which are sliced off below.
    out = pl.pallas_call(
        _disc_kernel,
        out_shape=jax.ShapeDtypeStruct((1, n_out), out_dtype),
        grid_spec=pltpu.PrefetchScalarGridSpec(
            num_scalar_prefetch=0,
            grid=(num_tiles,),
            in_specs=[
                pl.BlockSpec((1, h), lambda i: (0, 0)),       # ws (grid-invariant)
                pl.BlockSpec((tile_n, h), lambda i: (i, 0)),  # features row tile
            ],
            out_specs=pl.BlockSpec((1, tile_n), lambda i: (0, i)),
        ),
        compiler_params=pltpu.CompilerParams(
            dimension_semantics=("parallel",),
            vmem_limit_bytes=vmem_limit,
        ),
        cost_estimate=cost,
    )(ws, features)

    return out[0, :n]


def init_discriminator_params(key, n_hidden, dtype=jnp.float32):
    # Matches PyTorch reset_parameters: uniform(-1/sqrt(H), 1/sqrt(H))
    bound = 1.0 / math.sqrt(n_hidden)
    weight = jax.random.uniform(
        key, (n_hidden, n_hidden), dtype=dtype, minval=-bound, maxval=bound
    )
    return weight


if __name__ == "__main__":
    key = jax.random.PRNGKey(0)
    k_w, k_f, k_s, k_w2, k_f2, k_s2 = jax.random.split(key, 6)

    # Case 1: tiny shapes consistent with the module (hidden=32, nodes=8).
    n_hidden, n_nodes = 32, 8
    weight = init_discriminator_params(k_w, n_hidden)
    features = jax.random.normal(k_f, (n_nodes, n_hidden), dtype=jnp.float32)
    summary = jax.random.normal(k_s, (n_hidden,), dtype=jnp.float32)

    out = jax.block_until_ready(discriminator_forward(features, weight, summary))
    ref = features @ (weight @ summary)
    assert out.shape == (n_nodes,)
    assert jnp.allclose(out, ref, atol=1e-4, rtol=1e-4), "mismatch vs reference (case 1)"

    # Case 2: node count not divisible by the tile -> exercises the partial
    # last block (no jnp.pad copy) and the >=2-tile megacore split.
    n_hidden2, n_nodes2 = 64, 300
    weight2 = init_discriminator_params(k_w2, n_hidden2)
    features2 = jax.random.normal(k_f2, (n_nodes2, n_hidden2), dtype=jnp.float32)
    summary2 = jax.random.normal(k_s2, (n_hidden2,), dtype=jnp.float32)

    out2 = jax.block_until_ready(discriminator_forward(features2, weight2, summary2))
    ref2 = features2 @ (weight2 @ summary2)
    assert out2.shape == (n_nodes2,)
    assert jnp.allclose(out2, ref2, atol=1e-4, rtol=1e-4), "mismatch vs reference (case 2)"

    print("KERNEL_OK")
</pallas_src>

<mosaic_0001>
module attributes {stable_mosaic.version = 11 : i64} {
  func.func @_disc_kernel(%arg0: i32, %arg1: memref<1x32xf32, #tpu.memory_space<vmem>>, %arg2: memref<128x32xf32, #tpu.memory_space<vmem>>, %arg3: memref<1x128xf32, #tpu.memory_space<vmem>>) attributes {dimension_semantics = [#tpu.dimension_semantics<parallel>], iteration_bounds = array<i64: 1>, scalar_prefetch = 0 : i64, scratch_operands = 0 : i64, tpu.core_type = #tpu.core_type<tc>, window_params = [{pipeline_mode = #tpu.pipeline_mode<synchronous>, transform_indices = @transform_0, window_bounds = array<i64: 1, 32>}, {transform_indices = @transform_1, window_bounds = array<i64: 128, 32>}, {transform_indices = @transform_2, window_bounds = array<i64: 1, 128>}]} {
    %c0 = arith.constant 0 : index
    %c0_0 = arith.constant 0 : index
    %0 = vector.load %arg1[%c0, %c0_0] : memref<1x32xf32, #tpu.memory_space<vmem>>, vector<1x32xf32>
    %c0_1 = arith.constant 0 : index
    %c0_2 = arith.constant 0 : index
    %1 = vector.load %arg2[%c0_1, %c0_2] : memref<128x32xf32, #tpu.memory_space<vmem>>, vector<128x32xf32>
    %cst = arith.constant dense<0.000000e+00> : vector<1x128xf32>
    %2 = tpu.matmul %0, %1, %cst {dimension_numbers = #tpu.dot_dimension_numbers<[1], [1], [0], [0], [0, 0, 1, 0], [], []>} : vector<1x32xf32>, vector<128x32xf32>, vector<1x128xf32> -> vector<1x128xf32>
    %c0_3 = arith.constant 0 : index
    %c0_4 = arith.constant 0 : index
    %3 = vector.load %arg3[%c0_3, %c0_4] : memref<1x128xf32, #tpu.memory_space<vmem>>, vector<1x128xf32>
    tpu.vector_store %arg3[%c0_3, %c0_4], %2 {strides = array<i32>} : memref<1x128xf32, #tpu.memory_space<vmem>>, vector<1x128xf32>,
    return
  }
  func.func @transform_0(%arg0: i32) -> (i32, i32) {
    %c0_i32 = arith.constant 0 : i32
    %c0_i32_0 = arith.constant 0 : i32
    %c0_i32_1 = arith.constant 0 : i32
    return %c0_i32, %c0_i32_0 : i32, i32
  }
  func.func @transform_1(%arg0: i32) -> (i32, i32) {
    %c0_i32 = arith.constant 0 : i32
    %c0_i32_0 = arith.constant 0 : i32
    return %arg0, %c0_i32 : i32, i32
  }
  func.func @transform_2(%arg0: i32) -> (i32, i32) {
    %c0_i32 = arith.constant 0 : i32
    %c0_i32_0 = arith.constant 0 : i32
    return %c0_i32, %arg0 : i32, i32
  }
}

</mosaic_0001>

<bundles_post_ra>
// kernel: tpu_custom_call.1
= control target key start
LH: loop header
LB: loop body
LE: loop exit
PB: predicated region body
PF: predicated region fallthrough
CT: control target
= control target key end

     0   :  { %7 = vsyncpa [#allocation3], 0  ;;  %s457_s0 = inlined_call_operand.hbm [shape: f32[1,32], index: 0, kind: input, shape index: {}]   ;;  %s458_s1 = inlined_call_operand.hbm [shape: f32[8,32], index: 1, kind: input, shape index: {}]   ;;  %s459_s2 = inlined_call_operand.hbm [shape: f32[1,128], index: 2, kind: output, shape index: {}]  }
   0x1   :  { %8 = vsyncpa [#allocation6], 0 }
   0x2   :  { %9 = vsyncpa [#allocation4], 0  ;;  %s375_s9 = smov [#allocation2]   ;;  %s303_s13 = scalar_lea.hbm %s457_s0, 16 }
   0x3   :  { %s16_s10 = sshll.u32 %s375_s9, 4  ;;  %p304_p0 = scmp.ne.s32.totalorder %s457_s0, %s303_s13  ;;  %s17_s10 = int_to_ptr.vmem [resolvable:$true] %s16_s10 }
   0x4   :  { %p307_p1 = scmp.lt.u32.totalorder %s303_s13, %s457_s0 }
   0x6   :  { %p309_p2 = pnand %p307_p1, %p304_p0 }
   0x8   :  { %312 = shalt.err (!%p309_p2)
}
   0x9   :  { %s313_s18 = scalar_lea.vmem %s17_s10, 16  ;;  %s317_s19 = scalar_lea.vmem %s17_s10, 32 }
   0xa   :  { %p314_p3 = scmp.ne.s32.totalorder %s17_s10, %s313_s18  ;;  %p318_p4 = scmp.lt.s32.totalorder %s17_s10, %s17_s10 }
   0xb   :  { %p319_p5 = scmp.lt.s32.totalorder %s317_s19, %s313_s18 }
   0xd   :  { %p320_p6 = por %p319_p5, %p318_p4 }
   0xf   :  { %p321_p7 = pnand %p320_p6, %p314_p3 }
  0x11   :  { %324 = shalt.err (!%p321_p7)
}
  0x12   :  { %19 = dma.hbm_to_vmem [thread:$0]  %s457_s0, 16, %s17_s10, [#allocation3]  }
  0x13   :  { %24 = vsyncadd [#allocation6], 1920  ;;  %s376_s22 = smov [#allocation5]   ;;  %s325_s26 = scalar_lea.hbm %s458_s1, 128 }
  0x14   :  { %s25_s23 = sshll.u32 %s376_s22, 4  ;;  %p326_p8 = scmp.ne.s32.totalorder %s458_s1, %s325_s26  ;;  %s26_s23 = int_to_ptr.vmem [resolvable:$true] %s25_s23 }
  0x15   :  { %p329_p9 = scmp.lt.u32.totalorder %s325_s26, %s458_s1 }
  0x17   :  { %p331_p10 = pnand %p329_p9, %p326_p8 }
  0x19   :  { %334 = shalt.err (!%p331_p10)
}
  0x1a   :  { %s335_s3 = scalar_lea.vmem %s26_s23, 128  ;;  %s339_s0 = scalar_lea.vmem %s26_s23, 2048 }
  0x1b   :  { %p336_p11 = scmp.ne.s32.totalorder %s26_s23, %s335_s3  ;;  %p340_p12 = scmp.lt.s32.totalorder %s26_s23, %s26_s23 }
  0x1c   :  { %p341_p13 = scmp.lt.s32.totalorder %s339_s0, %s335_s3 }
  0x1e   :  { %p342_p0 = por %p341_p13, %p340_p12 }
  0x20   :  { %p343_p1 = pnand %p342_p0, %p336_p11 }
  0x22   :  { %346 = shalt.err (!%p343_p1)
}
  0x23   :  { %s377_s4 = smov 128   ;;  %s378_s5 = smov 8  }
  0x24   :  { %31 = dma.hbm_to_vmem [thread:$0]  %s458_s1, 128, %s26_s23, [#allocation6], %s377_s4, %s377_s4, %s378_s5  }
  0x25   :  { %369 = dma.done.wait [#allocation3], 16  }
  0x26   :  { %370 = vsyncadd [#allocation3], 4294967280 }
  0x27   :  { %371 = dma.done.wait [#allocation6], 2048  }
  0x28   :  { %372 = vsyncadd [#allocation6], 4294965248  ;;  %v379_v0 = vmov 0.0|0.0   ;;  %vm380_vm0 = vmmov 0   ;;  %v381_v1 = vmov 0.0   ;;  %vm55_vm1 = vcmask 261120  }
  0x29   :  { %263 = vmatprep.subr.bf16.mxu0 %v379_v0  ;;  %260 = vmatprep.mubr.msk.f32.mxu0 %vm380_vm0, %v381_v1  ;;  %v39_v2 = vld [vmem:[#allocation5] sm:$0xff]  ;;  %v40_v3 = vld [vmem:[#allocation5 + $0x8] sm:$0xff]  ;;  %vm424_vm2 = vmpackc.low %vm55_vm1, %vm55_vm1  ;;  %s382_s1 = smov [#allocation7]  }
  0x2a   :  { %v264_v5 = vpack.c.bf16 %v40_v3, %v39_v2  ;;  %v41_v6 = vld [vmem:[#allocation5 + $0x10] sm:$0xff]  ;;  %v42_v7 = vld [vmem:[#allocation5 + $0x18] sm:$0xff]  ;;  %v43_v9 = vld [vmem:[#allocation5 + $0x20] sm:$0xff]  ;;  %s184_s8 = sshll.u32 %s382_s1, 4  ;;  %s185_s8 = int_to_ptr.vmem [resolvable:$true] %s184_s8 }
  0x2b   :  { %v268_v8 = vpack.c.bf16 %v42_v7, %v41_v6  ;;  %v44_v10 = vld [vmem:[#allocation5 + $0x28] sm:$0xff]  ;;  %v45_v12 = vld [vmem:[#allocation5 + $0x30] sm:$0xff]  ;;  %v46_v13 = vld [vmem:[#allocation5 + $0x38] sm:$0xff]  ;;  %s347_s9 = scalar_lea.vmem %s185_s8, 16  ;;  %s351_s10 = scalar_lea.vmem %s185_s8, 32 }
  0x2c   :  { %266 = vmatpush3.bf16.xpose.msk.msra.mxu0 %vm424_vm2, %v264_v5  ;;  %v272_v11 = vpack.c.bf16 %v44_v10, %v43_v9  ;;  %v276_v14 = vpack.c.bf16 %v46_v13, %v45_v12  ;;  %v47_v15 = vld [vmem:[#allocation5 + $0x40] sm:$0xff]  ;;  %v48_v16 = vld [vmem:[#allocation5 + $0x48] sm:$0xff]  ;;  %v49_v18 = vld [vmem:[#allocation5 + $0x50] sm:$0xff]  ;;  %p348_p2 = scmp.ne.s32.totalorder %s185_s8, %s347_s9  ;;  %p352_p3 = scmp.lt.s32.totalorder %s185_s8, %s185_s8 }
  0x2d   :  { %267 = vmatprep.subr.bf16.mxu0 %v379_v0  ;;  %v280_v17 = vpack.c.bf16 %v48_v16, %v47_v15  ;;  %v50_v19 = vld [vmem:[#allocation5 + $0x58] sm:$0xff]  ;;  %v51_v21 = vld [vmem:[#allocation5 + $0x60] sm:$0xff]  ;;  %v52_v22 = vld [vmem:[#allocation5 + $0x68] sm:$0xff]  ;;  %p353_p4 = scmp.lt.s32.totalorder %s351_s10, %s347_s9 }
  0x2e   :  { %v284_v20 = vpack.c.bf16 %v50_v19, %v49_v18  ;;  %v288_v23 = vpack.c.bf16 %v52_v22, %v51_v21  ;;  %v53_v24 = vld [vmem:[#allocation5 + $0x70] sm:$0xff]  ;;  %v54_v25 = vld [vmem:[#allocation5 + $0x78] sm:$0xff] }
  0x2f   :  { %v292_v26 = vpack.c.bf16 %v54_v25, %v53_v24  ;;  %v38_v27 = vld [vmem:[#allocation2] sm:$0x1]  ;;  %p354_p5 = por %p353_p4, %p352_p3 }
  0x31   :  { %p355_p6 = pnand %p354_p5, %p348_p2 }
  0x34   :  { %270 = vmatpush3.bf16.xpose.msk.msra.mxu0 %vm424_vm2, %v268_v8 }
  0x35   :  { %271 = vmatprep.subr.bf16.mxu0 %v379_v0 }
  0x3c   :  { %274 = vmatpush3.bf16.xpose.msk.msra.mxu0 %vm424_vm2, %v272_v11 }
  0x3d   :  { %275 = vmatprep.subr.bf16.mxu0 %v379_v0 }
  0x44   :  { %278 = vmatpush3.bf16.xpose.msk.msra.mxu0 %vm424_vm2, %v276_v14 }
  0x45   :  { %279 = vmatprep.subr.bf16.mxu0 %v379_v0 }
  0x4c   :  { %282 = vmatpush3.bf16.xpose.msk.msra.mxu0 %vm424_vm2, %v280_v17 }
  0x4d   :  { %283 = vmatprep.subr.bf16.mxu0 %v379_v0 }
  0x54   :  { %286 = vmatpush3.bf16.xpose.msk.msra.mxu0 %vm424_vm2, %v284_v20 }
  0x55   :  { %287 = vmatprep.subr.bf16.mxu0 %v379_v0 }
  0x5c   :  { %290 = vmatpush3.bf16.xpose.msk.msra.mxu0 %vm424_vm2, %v288_v23 }
  0x5d   :  { %291 = vmatprep.subr.bf16.mxu0 %v379_v0 }
  0x64   :  { %294 = vmatpush3.bf16.xpose.msk.msra.mxu0 %vm424_vm2, %v292_v26 }
  0x6b   :  { %261 = vmatmul.mubr.msk.f32.vlgmr.msra.gmra.mrb[0].mxu0 %vm55_vm1, %v38_v27 }
 0x13e   :  { %v173_v28 = vpop.f32.mrb[0].mxu0 }
 0x13f   :  { %177 = vst [vmem:[#allocation7] sm:$0x1] %v173_v28  ;;  %v262_v29 = vpop.f32.mrb[1].mxu0 }
 0x140   :  { %358 = shalt.err (!%p355_p6)
}
 0x141   :  { %s359_s13 = scalar_lea.hbm %s459_s2, 16 }
 0x142   :  { %p360_p7 = scmp.ne.s32.totalorder %s459_s2, %s359_s13  ;;  %p363_p8 = scmp.lt.u32.totalorder %s359_s13, %s459_s2 }
 0x144   :  { %p365_p9 = pnand %p363_p8, %p360_p7 }
 0x146   :  { %368 = shalt.err (!%p365_p9)
}
 0x147   :  { %187 = dma.vmem_to_hbm [thread:$0]  %s185_s8, 16, %s459_s2, [#allocation4]  }
 0x148   :  { %373 = dma.done.wait [#allocation4], 16  }
 0x149   :  { %374 = vsyncadd [#allocation4], 4294967280 }
 0x14a   :  { %191 = vsyncpa [#allocation3], 1 }
 0x14b   :  { %192 = vsyncpa [#allocation6], 1 }
 0x14c   :  { %193 = vsyncpa [#allocation4], 1 }

</bundles_post_ra>
